<compile_context>
chip_gen: v6e
topology: v6e:2x2x1
jax: 0.10.0
libtpu: 0.0.40
codegen_flags: <defaults>
</compile_context>

<pallas_src>
import jax
import jax.numpy as jnp
from jax import lax
from jax.experimental import pallas as pl
from jax.experimental.pallas import tpu as pltpu

EPS = 1e-10        # MixedCombinedLoss eps
DICE_EPS = 1e-4    # dice_loss default eps
SMOOTH = 0.0       # DiceLoss default smooth
W_NLL = 0.3        # criteria_weight[0]
W_DICE = 0.7       # criteria_weight[1]


def _cdiv(a, b):
    return -(-a // b)


def _round_up(a, m):
    return _cdiv(a, m) * m


def _vmem_limit_bytes():
    """Scoped-VMEM limit: half of physical VMEM, capped at 64 MiB."""
    try:
        cap = int(pltpu.get_tpu_info().vmem_capacity_bytes)
    except Exception:
        cap = 64 * 1024 * 1024          # conservative (v7x-sized) fallback
    return max(16 * 1024 * 1024, min(cap // 2, 64 * 1024 * 1024))


def _make_kernel(C, rt, npps, nsplit, num_pt, p_true, needs_mask):
    """Build the kernel with trace-time constants baked in."""
    n_fold = rt // 8
    # valid pixels inside the (only possibly padded) globally-last pixel tile
    rem_last = p_true - (num_pt - 1) * rt * 128

    def fold(v):
        # (rt, 128) -> (8, 128): pure vreg adds, no cross-lane reduce in-loop
        return jnp.sum(v.reshape(n_fold, 8, 128), axis=0)

    def kernel(tc_ref, logits_ref, target_ref, acc_ref):
        i = pl.program_id(0)    # sample
        s = pl.program_id(1)    # core split
        p = pl.program_id(2)    # pixel tile within the split

        @pl.when(p == 0)
        def _init():
            acc_ref[...] = jnp.zeros_like(acc_ref)

        tc = tc_ref[i]                                  # scalar int32 (SMEM)

        # ---- channel-streamed, numerically-stable softmax pieces ----------
        # pass 1: per-pixel channel max
        m = logits_ref[0, 0, :, :].astype(jnp.float32)          # (rt, 128)
        for c in range(1, C):
            m = jnp.maximum(m, logits_ref[0, c, :, :].astype(jnp.float32))

        # pass 2: exp, split into target-channel term and "all others" term
        e_t = jnp.zeros((rt, 128), jnp.float32)
        s_wo = jnp.zeros((rt, 128), jnp.float32)
        for c in range(C):
            ec = jnp.exp(logits_ref[0, c, :, :].astype(jnp.float32) - m)
            on = tc == c
            e_t = e_t + jnp.where(on, ec, 0.0)
            s_wo = s_wo + jnp.where(on, 0.0, ec)
        ssum = e_t + s_wo

        # target-class logit via dynamic ref slice (no one-hot, no extra exp)
        x_t = logits_ref[0, pl.ds(tc, 1), :, :][0].astype(jnp.float32)
        sh_t = x_t - m

        log_s = jnp.log(ssum)
        log_fg = sh_t - log_s                    # log softmax, target channel
        log_bg = jnp.log(s_wo) - log_s           # log softmax, "everything else"

        # softmax prob of the target channel; approx reciprocal + 1 Newton step
        r = pl.reciprocal(ssum, approx=True)
        r = r * (2.0 - ssum * r)
        p_fg = (1.0 - EPS) * (e_t * r) + EPS

        t = target_ref[0, :, :] != 0             # (rt, 128) bool (int8 input)
        tf = t.astype(jnp.float32)
        picked = jnp.where(t, log_fg, log_bg)

        # Background-channel sums are recovered algebraically in the wrapper:
        #   ibg = P - Σtf - Σp_fg + Σ(p_fg·tf),  dbg = 2P - (Σp_fg + Σtf)
        # The two sums below are padding-safe as-is because padded target == 0.
        acc_ref[0, 0, 8:16, :] += fold(p_fg * tf)     # Σ p_fg·tf
        acc_ref[0, 0, 24:32, :] += fold(tf)           # Σ tf

        def acc_rest(picked_v, p_fg_v):
            acc_ref[0, 0, 0:8, :] += fold(picked_v)   # Σ picked log-prob
            acc_ref[0, 0, 16:24, :] += fold(p_fg_v)   # Σ p_fg

        if needs_mask:
            # padding only ever lives in the globally-last pixel tile
            is_last = jnp.logical_and(s == nsplit - 1, p == npps - 1)

            @pl.when(jnp.logical_not(is_last))
            def _unmasked():
                acc_rest(picked, p_fg)

            @pl.when(is_last)
            def _masked():
                row = lax.broadcasted_iota(jnp.int32, (rt, 128), 0)
                lane = lax.broadcasted_iota(jnp.int32, (rt, 128), 1)
                valid = ((row * 128 + lane) < rem_last).astype(jnp.float32)
                acc_rest(picked * valid, p_fg * valid)
        else:
            acc_rest(picked, p_fg)

    return kernel


def mixed_combined_loss(output_direct, target, target_class, class_weight,
                        *, max_rows_per_tile=None):
    """JAX/Pallas equivalent of MixedCombinedLoss.forward."""
    N, C, H, W = output_direct.shape
    P = H * W
    R = _cdiv(P, 128)                                  # rows of 128 lanes

    # -- tile sizing: VMEM model includes pipeline buffers + in-kernel temps --
    vmem_limit = _vmem_limit_bytes()
    itemsize = jnp.dtype(output_direct.dtype).itemsize
    pipe_row = 2 * 128 * (C * itemsize + 1)            # 2x-buffered logits + int8 tgt
    temp_row = 20 * 128 * 4                            # ~20 live f32 (rt,128) temps
    rt_budget = (vmem_limit // 2) // (pipe_row + temp_row)
    rt_budget = max(32, min(int(rt_budget), 8192))
    if max_rows_per_tile is not None:
        rt_budget = max(32, min(rt_budget, int(max_rows_per_tile)))

    # Prefer a tile-row count that divides R exactly (and is a multiple of 32)
    # so the wrapper never materialises a padded copy of the logits.
    num_pt = _cdiv(R, rt_budget)
    chosen = None
    hi = min(max(num_pt, R // 32), 4 * num_pt)
    for cand in range(num_pt, hi + 1):
        if R % cand == 0 and (R // cand) % 32 == 0:
            chosen = cand
            break
    if chosen is not None:
        num_pt = chosen
        rt = R // num_pt
    else:
        # TODO(synk): truly ragged tails could use a second small pallas_call
        # (or a manual pl.ANY DMA) instead of zero-padding the whole tensor.
        rt = _round_up(_cdiv(R, num_pt), 32)
        num_pt = _cdiv(R, rt)          # guarantees padding lives in < one tile

    nsplit = 2 if (num_pt % 2 == 0) else 1   # engage both v7x cores at small N
    npps = num_pt // nsplit
    r_pad = rt * num_pt
    p_pad = r_pad * 128
    needs_mask = p_pad != P

    # -- layout glue: lane-dense (r_pad, 128) pixels, native logits, int8 tgt --
    logits = output_direct.reshape(N, C, P)
    tgt = (target.reshape(N, P) != 0).astype(jnp.int8)   # binarised, 1 B/pixel
    if needs_mask:
        logits = jnp.pad(logits, ((0, 0), (0, 0), (0, p_pad - P)))
        tgt = jnp.pad(tgt, ((0, 0), (0, p_pad - P)))
    logits = logits.reshape(N, C, r_pad, 128)
    tgt = tgt.reshape(N, r_pad, 128)
    tc = target_class.astype(jnp.int32)

    kernel = _make_kernel(C, rt, npps, nsplit, num_pt, P, needs_mask)

    partials = pl.pallas_call(
        kernel,
        out_shape=jax.ShapeDtypeStruct((N, nsplit, 32, 128), jnp.float32),
        grid_spec=pltpu.PrefetchScalarGridSpec(
            num_scalar_prefetch=1,
            grid=(N, nsplit, npps),
            in_specs=[
                pl.BlockSpec((1, C, rt, 128),
                             lambda i, s, p, tc_r: (i, 0, s * npps + p, 0)),
                pl.BlockSpec((1, rt, 128),
                             lambda i, s, p, tc_r: (i, s * npps + p, 0)),
            ],
            out_specs=pl.BlockSpec((1, 1, 32, 128),
                                   lambda i, s, p, tc_r: (i, s, 0, 0)),
        ),
        compiler_params=pltpu.CompilerParams(
            dimension_semantics=("parallel", "parallel", "arbitrary"),
            vmem_limit_bytes=int(vmem_limit)),
    )(tc, logits, tgt)

    # -- tiny finalize in plain JAX (N x 4 numbers) --------------------------
    sums = jnp.sum(partials.reshape(N, nsplit, 4, 8 * 128), axis=(1, 3))  # (N,4)
    nll_sum, ifg, pfg_sum, tf_sum = sums[:, 0], sums[:, 1], sums[:, 2], sums[:, 3]

    Pf = jnp.float32(P)
    nll = -nll_sum / Pf                                  # NLLLoss(reduction=mean)
    dfg = pfg_sum + tf_sum
    dice_fg = 1.0 - (2.0 * ifg + SMOOTH) / (dfg + SMOOTH + DICE_EPS)
    ibg = Pf - tf_sum - pfg_sum + ifg                    # Σ (1-p_fg)(1-tf)
    dbg = 2.0 * Pf - dfg                                 # Σ (1-p_fg)+(1-tf)
    dice_bg = 1.0 - (2.0 * ibg + SMOOTH) / (dbg + SMOOTH + DICE_EPS)
    dice = 0.5 * (dice_bg + dice_fg)

    # torch loop order: all NLL terms first, then all Dice terms
    cw = class_weight.astype(jnp.float32)[tc]            # per-sample class weight
    loss = jnp.sum(W_NLL * cw * nll) + jnp.sum(W_DICE * cw * dice)
    return loss


def reference_loss(output_direct, target, target_class, class_weight):
    """Pure-JAX re-implementation of the PyTorch forward, for verification."""
    N, C, H, W = output_direct.shape
    modified_target = (target != 0).astype(jnp.int32)            # (N, H, W)
    logit_max = jnp.max(output_direct, axis=1, keepdims=True)
    shifted = output_direct - logit_max
    sm = jax.nn.softmax(shifted, axis=1)
    sm = (1.0 - EPS) * sm + EPS
    s_fg = sm[jnp.arange(N), target_class][:, None]              # (N,1,H,W)
    softmax_output = jnp.concatenate([1.0 - s_fg, s_fg], axis=1)  # (N,2,H,W)

    expo = jnp.exp(shifted)
    S = jnp.sum(expo, axis=1, keepdims=True)
    logS = jnp.log(S)
    log_sm_i = shifted - logS
    log_sm_minus_i = jnp.log(S - expo) - logS
    l_i = log_sm_i[jnp.arange(N), target_class][:, None]
    l_mi = log_sm_minus_i[jnp.arange(N), target_class][:, None]
    log_softmax_output = jnp.concatenate([l_mi, l_i], axis=1)     # (N,2,H,W)

    loss = 0.0
    for i in range(N):   # nn.NLLLoss criterion
        t = modified_target[i]
        lsm = log_softmax_output[i]
        picked = jnp.where(t == 1, lsm[1], lsm[0])
        nll = -jnp.mean(picked)
        loss += nll * W_NLL * class_weight[target_class[i]]
    for i in range(N):   # DiceLoss(apply_softmax=False) criterion
        t = modified_target[i].astype(jnp.float32)
        probs = softmax_output[i]                                 # (2,H,W)
        onehot = jnp.stack([1.0 - t, t], axis=0)
        num = 2.0 * jnp.sum(probs * onehot, axis=(1, 2)) + SMOOTH
        den = jnp.sum(probs + onehot, axis=(1, 2)) + SMOOTH + DICE_EPS
        dice = jnp.mean(1.0 - num / den)
        loss += dice * W_DICE * class_weight[target_class[i]]
    return loss


if __name__ == "__main__":
    key = jax.random.PRNGKey(0)
    N, C, H, W = 2, 4, 16, 16
    k1, k2, k3 = jax.random.split(key, 3)

    # Inputs consistent with the torch forward:
    #   output_direct : (N, C, H, W) logits
    #   target        : (N, H, W) integer labels (binarised internally)
    #   target_class  : (N,) integer class index per sample
    output_direct = jax.random.normal(k1, (N, C, H, W), dtype=jnp.float32)
    target = (jax.random.uniform(k2, (N, H, W)) > 0.5).astype(jnp.int32)
    target_class = jax.random.randint(k3, (N,), 0, C)
    class_weight = jnp.array([1.0, 2.0, 0.5, 1.5], dtype=jnp.float32)  # (C,)

    # TODO(synk): the torch-side runtime assert on <=2 unique target labels is
    # a data-validation check and is not replicated in the kernel.
    loss = mixed_combined_loss(output_direct, target, target_class, class_weight)
    loss = jax.block_until_ready(loss)
    ref = reference_loss(output_direct, target, target_class, class_weight)
    assert jnp.allclose(loss, ref, rtol=1e-5, atol=1e-5), (loss, ref)

    # Extra small checks exercising the multi-tile / core-split / masked paths.
    k4, k5, k6 = jax.random.split(jax.random.PRNGKey(1), 3)
    for (h2, w2) in [(128, 128),    # multi-tile, nsplit=2, no padding
                     (100, 96)]:    # multi-tile, padded + masked last tile
        od2 = jax.random.normal(k4, (N, C, h2, w2), dtype=jnp.float32)
        tg2 = (jax.random.uniform(k5, (N, h2, w2)) > 0.5).astype(jnp.int32)
        tc2 = jax.random.randint(k6, (N,), 0, C)
        out2 = mixed_combined_loss(od2, tg2, tc2, class_weight,
                                   max_rows_per_tile=32)
        out2 = jax.block_until_ready(out2)
        ref2 = reference_loss(od2, tg2, tc2, class_weight)
        assert jnp.allclose(out2, ref2, rtol=1e-4, atol=1e-4), (h2, w2, out2, ref2)

    print("KERNEL_OK")
</pallas_src>

<mosaic_0001>
module attributes {stable_mosaic.version = 11 : i64} {
  func.func @kernel(%arg0: i32, %arg1: i32, %arg2: i32, %arg3: memref<2xi32, #tpu.memory_space<smem>>, %arg4: memref<1x4x32x128xf32, #tpu.memory_space<vmem>>, %arg5: memref<1x32x128xi8, #tpu.memory_space<vmem>>, %arg6: memref<1x1x32x128xf32, #tpu.memory_space<vmem>>) attributes {dimension_semantics = [#tpu.dimension_semantics<parallel>, #tpu.dimension_semantics<parallel>, #tpu.dimension_semantics<arbitrary>], iteration_bounds = array<i64: 2, 1, 1>, scalar_prefetch = 1 : i64, scratch_operands = 0 : i64, tpu.core_type = #tpu.core_type<tc>, window_params = [{transform_indices = @transform_0, window_bounds = array<i64: 1, 4, 32, 128>}, {transform_indices = @transform_1, window_bounds = array<i64: 1, 32, 128>}, {transform_indices = @transform_2, window_bounds = array<i64: 1, 1, 32, 128>}]} {
    %c0_i32 = arith.constant 0 : i32
    %0 = arith.cmpi eq, %arg2, %c0_i32 : i32
    %1 = arith.extui %0 : i1 to i32
    %c0_i32_0 = arith.constant 0 : i32
    %2 = arith.cmpi ne, %1, %c0_i32_0 : i32
    scf.if %2 {
      %cst_68 = arith.constant 0.000000e+00 : f32
      %114 = vector.broadcast %cst_68 : f32 to vector<1x1x32x128xf32>
      %c0_69 = arith.constant 0 : index
      %c0_70 = arith.constant 0 : index
      %c0_71 = arith.constant 0 : index
      %c0_72 = arith.constant 0 : index
      %115 = vector.load %arg6[%c0_69, %c0_70, %c0_71, %c0_72] : memref<1x1x32x128xf32, #tpu.memory_space<vmem>>, vector<1x1x32x128xf32>
      tpu.vector_store %arg6[%c0_69, %c0_70, %c0_71, %c0_72], %114 {strides = array<i32>} : memref<1x1x32x128xf32, #tpu.memory_space<vmem>>, vector<1x1x32x128xf32>,
    } else {
    }
    %3 = arith.index_cast %arg0 : i32 to index
    %4 = memref.load %arg3[%3] : memref<2xi32, #tpu.memory_space<smem>>
    %c0 = arith.constant 0 : index
    %c0_1 = arith.constant 0 : index
    %c0_2 = arith.constant 0 : index
    %c0_3 = arith.constant 0 : index
    %5 = vector.load %arg4[%c0, %c0_1, %c0_2, %c0_3] : memref<1x4x32x128xf32, #tpu.memory_space<vmem>>, vector<1x1x32x128xf32>
    %6 = vector.shape_cast %5 : vector<1x1x32x128xf32> to vector<32x128xf32>
    %c0_4 = arith.constant 0 : index
    %c1 = arith.constant 1 : index
    %c0_5 = arith.constant 0 : index
    %c0_6 = arith.constant 0 : index
    %7 = vector.load %arg4[%c0_4, %c1, %c0_5, %c0_6] : memref<1x4x32x128xf32, #tpu.memory_space<vmem>>, vector<1x1x32x128xf32>
    %8 = vector.shape_cast %7 : vector<1x1x32x128xf32> to vector<32x128xf32>
    %9 = arith.maximumf %6, %8 : vector<32x128xf32>
    %c0_7 = arith.constant 0 : index
    %c2 = arith.constant 2 : index
    %c0_8 = arith.constant 0 : index
    %c0_9 = arith.constant 0 : index
    %10 = vector.load %arg4[%c0_7, %c2, %c0_8, %c0_9] : memref<1x4x32x128xf32, #tpu.memory_space<vmem>>, vector<1x1x32x128xf32>
    %11 = vector.shape_cast %10 : vector<1x1x32x128xf32> to vector<32x128xf32>
    %12 = arith.maximumf %9, %11 : vector<32x128xf32>
    %c0_10 = arith.constant 0 : index
    %c3 = arith.constant 3 : index
    %c0_11 = arith.constant 0 : index
    %c0_12 = arith.constant 0 : index
    %13 = vector.load %arg4[%c0_10, %c3, %c0_11, %c0_12] : memref<1x4x32x128xf32, #tpu.memory_space<vmem>>, vector<1x1x32x128xf32>
    %14 = vector.shape_cast %13 : vector<1x1x32x128xf32> to vector<32x128xf32>
    %15 = arith.maximumf %12, %14 : vector<32x128xf32>
    %cst = arith.constant 0.000000e+00 : f32
    %16 = vector.broadcast %cst : f32 to vector<32x128xf32>
    %cst_13 = arith.constant 0.000000e+00 : f32
    %17 = vector.broadcast %cst_13 : f32 to vector<32x128xf32>
    %c0_14 = arith.constant 0 : index
    %c0_15 = arith.constant 0 : index
    %c0_16 = arith.constant 0 : index
    %c0_17 = arith.constant 0 : index
    %18 = vector.load %arg4[%c0_14, %c0_15, %c0_16, %c0_17] : memref<1x4x32x128xf32, #tpu.memory_space<vmem>>, vector<1x1x32x128xf32>
    %19 = vector.shape_cast %18 : vector<1x1x32x128xf32> to vector<32x128xf32>
    %20 = arith.subf %19, %15 : vector<32x128xf32>
    %21 = math.exp %20 : vector<32x128xf32>
    %c0_i32_18 = arith.constant 0 : i32
    %22 = arith.cmpi eq, %4, %c0_i32_18 : i32
    %cst_19 = arith.constant 0.000000e+00 : f32
    %23 = vector.broadcast %cst_19 : f32 to vector<32x128xf32>
    %24 = arith.select %22, %21, %23 : vector<32x128xf32>
    %25 = arith.addf %16, %24 : vector<32x128xf32>
    %cst_20 = arith.constant 0.000000e+00 : f32
    %26 = vector.broadcast %cst_20 : f32 to vector<32x128xf32>
    %27 = arith.select %22, %26, %21 : vector<32x128xf32>
    %28 = arith.addf %17, %27 : vector<32x128xf32>
    %c0_21 = arith.constant 0 : index
    %c1_22 = arith.constant 1 : index
    %c0_23 = arith.constant 0 : index
    %c0_24 = arith.constant 0 : index
    %29 = vector.load %arg4[%c0_21, %c1_22, %c0_23, %c0_24] : memref<1x4x32x128xf32, #tpu.memory_space<vmem>>, vector<1x1x32x128xf32>
    %30 = vector.shape_cast %29 : vector<1x1x32x128xf32> to vector<32x128xf32>
    %31 = arith.subf %30, %15 : vector<32x128xf32>
    %32 = math.exp %31 : vector<32x128xf32>
    %c1_i32 = arith.constant 1 : i32
    %33 = arith.cmpi eq, %4, %c1_i32 : i32
    %cst_25 = arith.constant 0.000000e+00 : f32
    %34 = vector.broadcast %cst_25 : f32 to vector<32x128xf32>
    %35 = arith.select %33, %32, %34 : vector<32x128xf32>
    %36 = arith.addf %25, %35 : vector<32x128xf32>
    %cst_26 = arith.constant 0.000000e+00 : f32
    %37 = vector.broadcast %cst_26 : f32 to vector<32x128xf32>
    %38 = arith.select %33, %37, %32 : vector<32x128xf32>
    %39 = arith.addf %28, %38 : vector<32x128xf32>
    %c0_27 = arith.constant 0 : index
    %c2_28 = arith.constant 2 : index
    %c0_29 = arith.constant 0 : index
    %c0_30 = arith.constant 0 : index
    %40 = vector.load %arg4[%c0_27, %c2_28, %c0_29, %c0_30] : memref<1x4x32x128xf32, #tpu.memory_space<vmem>>, vector<1x1x32x128xf32>
    %41 = vector.shape_cast %40 : vector<1x1x32x128xf32> to vector<32x128xf32>
    %42 = arith.subf %41, %15 : vector<32x128xf32>
    %43 = math.exp %42 : vector<32x128xf32>
    %c2_i32 = arith.constant 2 : i32
    %44 = arith.cmpi eq, %4, %c2_i32 : i32
    %cst_31 = arith.constant 0.000000e+00 : f32
    %45 = vector.broadcast %cst_31 : f32 to vector<32x128xf32>
    %46 = arith.select %44, %43, %45 : vector<32x128xf32>
    %47 = arith.addf %36, %46 : vector<32x128xf32>
    %cst_32 = arith.constant 0.000000e+00 : f32
    %48 = vector.broadcast %cst_32 : f32 to vector<32x128xf32>
    %49 = arith.select %44, %48, %43 : vector<32x128xf32>
    %50 = arith.addf %39, %49 : vector<32x128xf32>
    %c0_33 = arith.constant 0 : index
    %c3_34 = arith.constant 3 : index
    %c0_35 = arith.constant 0 : index
    %c0_36 = arith.constant 0 : index
    %51 = vector.load %arg4[%c0_33, %c3_34, %c0_35, %c0_36] : memref<1x4x32x128xf32, #tpu.memory_space<vmem>>, vector<1x1x32x128xf32>
    %52 = vector.shape_cast %51 : vector<1x1x32x128xf32> to vector<32x128xf32>
    %53 = arith.subf %52, %15 : vector<32x128xf32>
    %54 = math.exp %53 : vector<32x128xf32>
    %c3_i32 = arith.constant 3 : i32
    %55 = arith.cmpi eq, %4, %c3_i32 : i32
    %cst_37 = arith.constant 0.000000e+00 : f32
    %56 = vector.broadcast %cst_37 : f32 to vector<32x128xf32>
    %57 = arith.select %55, %54, %56 : vector<32x128xf32>
    %58 = arith.addf %47, %57 : vector<32x128xf32>
    %cst_38 = arith.constant 0.000000e+00 : f32
    %59 = vector.broadcast %cst_38 : f32 to vector<32x128xf32>
    %60 = arith.select %55, %59, %54 : vector<32x128xf32>
    %61 = arith.addf %50, %60 : vector<32x128xf32>
    %62 = arith.addf %58, %61 : vector<32x128xf32>
    %c0_39 = arith.constant 0 : index
    %63 = arith.index_cast %4 : i32 to index
    %c0_40 = arith.constant 0 : index
    %c0_41 = arith.constant 0 : index
    %64 = vector.load %arg4[%c0_39, %63, %c0_40, %c0_41] : memref<1x4x32x128xf32, #tpu.memory_space<vmem>>, vector<1x1x32x128xf32>
    %65 = vector.shape_cast %64 : vector<1x1x32x128xf32> to vector<1x32x128xf32>
    %66 = vector.shape_cast %65 : vector<1x32x128xf32> to vector<32x128xf32>
    %67 = arith.subf %66, %15 : vector<32x128xf32>
    %68 = math.log %62 : vector<32x128xf32>
    %69 = arith.subf %67, %68 : vector<32x128xf32>
    %70 = math.log %61 : vector<32x128xf32>
    %71 = arith.subf %70, %68 : vector<32x128xf32>
    %72 = tpu.reciprocal %62 {approx = true} : vector<32x128xf32> -> vector<32x128xf32>
    %73 = arith.mulf %62, %72 : vector<32x128xf32>
    %cst_42 = arith.constant 2.000000e+00 : f32
    %74 = vector.broadcast %cst_42 : f32 to vector<32x128xf32>
    %75 = arith.subf %74, %73 : vector<32x128xf32>
    %76 = arith.mulf %72, %75 : vector<32x128xf32>
    %77 = arith.mulf %58, %76 : vector<32x128xf32>
    %cst_43 = arith.constant 1.000000e+00 : f32
    %78 = vector.broadcast %cst_43 : f32 to vector<32x128xf32>
    %79 = arith.mulf %78, %77 : vector<32x128xf32>
    %cst_44 = arith.constant 1.000000e-10 : f32
    %80 = vector.broadcast %cst_44 : f32 to vector<32x128xf32>
    %81 = arith.addf %79, %80 : vector<32x128xf32>
    %c0_45 = arith.constant 0 : index
    %c0_46 = arith.constant 0 : index
    %c0_47 = arith.constant 0 : index
    %82 = vector.load %arg5[%c0_45, %c0_46, %c0_47] : memref<1x32x128xi8, #tpu.memory_space<vmem>>, vector<1x32x128xi8>
    %83 = vector.shape_cast %82 : vector<1x32x128xi8> to vector<32x128xi8>
    %c0_i8 = arith.constant 0 : i8
    %84 = vector.broadcast %c0_i8 : i8 to vector<32x128xi8>
    %85 = arith.cmpi ne, %83, %84 : vector<32x128xi8>
    %86 = arith.extui %85 : vector<32x128xi1> to vector<32x128xi32>
    %87 = arith.sitofp %86 : vector<32x128xi32> to vector<32x128xf32>
    %88 = arith.select %85, %69, %71 : vector<32x128xi1>, vector<32x128xf32>
    %c0_48 = arith.constant 0 : index
    %c0_49 = arith.constant 0 : index
    %c8 = arith.constant 8 : index
    %c0_50 = arith.constant 0 : index
    %89 = vector.load %arg6[%c0_48, %c0_49, %c8, %c0_50] : memref<1x1x32x128xf32, #tpu.memory_space<vmem>>, vector<1x1x8x128xf32>
    %90 = vector.shape_cast %89 : vector<1x1x8x128xf32> to vector<8x128xf32>
    %91 = arith.mulf %81, %87 : vector<32x128xf32>
    %92 = vector.shape_cast %91 : vector<32x128xf32> to vector<4x8x128xf32>
    %cst_51 = arith.constant dense<0.000000e+00> : vector<8x128xf32>
    %93 = vector.multi_reduction <add>, %92, %cst_51 [0] : vector<4x8x128xf32> to vector<8x128xf32>
    %94 = arith.addf %90, %93 : vector<8x128xf32>
    %c0_52 = arith.constant 0 : index
    %c0_53 = arith.constant 0 : index
    %c8_54 = arith.constant 8 : index
    %c0_55 = arith.constant 0 : index
    %95 = vector.load %arg6[%c0_52, %c0_53, %c8_54, %c0_55] : memref<1x1x32x128xf32, #tpu.memory_space<vmem>>, vector<1x1x8x128xf32>
    %96 = vector.shape_cast %95 : vector<1x1x8x128xf32> to vector<8x128xf32>
    %97 = vector.shape_cast %94 : vector<8x128xf32> to vector<1x1x8x128xf32>
    tpu.vector_store %arg6[%c0_52, %c0_53, %c8_54, %c0_55], %97 {strides = array<i32>} : memref<1x1x32x128xf32, #tpu.memory_space<vmem>>, vector<1x1x8x128xf32>,
    %c0_56 = arith.constant 0 : index
    %c0_57 = arith.constant 0 : index
    %c24 = arith.constant 24 : index
    %c0_58 = arith.constant 0 : index
    %98 = vector.load %arg6[%c0_56, %c0_57, %c24, %c0_58] : memref<1x1x32x128xf32, #tpu.memory_space<vmem>>, vector<1x1x8x128xf32>
    %99 = vector.shape_cast %98 : vector<1x1x8x128xf32> to vector<8x128xf32>
    %100 = vector.shape_cast %87 : vector<32x128xf32> to vector<4x8x128xf32>
    %cst_59 = arith.constant dense<0.000000e+00> : vector<8x128xf32>
    %101 = vector.multi_reduction <add>, %100, %cst_59 [0] : vector<4x8x128xf32> to vector<8x128xf32>
    %102 = arith.addf %99, %101 : vector<8x128xf32>
    %c0_60 = arith.constant 0 : index
    %c0_61 = arith.constant 0 : index
    %c24_62 = arith.constant 24 : index
    %c0_63 = arith.constant 0 : index
    %103 = vector.load %arg6[%c0_60, %c0_61, %c24_62, %c0_63] : memref<1x1x32x128xf32, #tpu.memory_space<vmem>>, vector<1x1x8x128xf32>
    %104 = vector.shape_cast %103 : vector<1x1x8x128xf32> to vector<8x128xf32>
    %105 = vector.shape_cast %102 : vector<8x128xf32> to vector<1x1x8x128xf32>
    tpu.vector_store %arg6[%c0_60, %c0_61, %c24_62, %c0_63], %105 {strides = array<i32>} : memref<1x1x32x128xf32, #tpu.memory_space<vmem>>, vector<1x1x8x128xf32>,
    %c0_i32_64 = arith.constant 0 : i32
    %106 = arith.cmpi eq, %arg1, %c0_i32_64 : i32
    %c0_i32_65 = arith.constant 0 : i32
    %107 = arith.cmpi eq, %arg2, %c0_i32_65 : i32
    %108 = arith.andi %106, %107 : i1
    %true = arith.constant true
    %109 = arith.xori %108, %true : i1
    %110 = arith.extui %109 : i1 to i32
    %c0_i32_66 = arith.constant 0 : i32
    %111 = arith.cmpi ne, %110, %c0_i32_66 : i32
    scf.if %111 {
      %c0_68 = arith.constant 0 : index
      %c0_69 = arith.constant 0 : index
      %c0_70 = arith.constant 0 : index
      %c0_71 = arith.constant 0 : index
      %114 = vector.load %arg6[%c0_68, %c0_69, %c0_70, %c0_71] : memref<1x1x32x128xf32, #tpu.memory_space<vmem>>, vector<1x1x8x128xf32>
      %115 = vector.shape_cast %114 : vector<1x1x8x128xf32> to vector<8x128xf32>
      %116 = vector.shape_cast %88 : vector<32x128xf32> to vector<4x8x128xf32>
      %cst_72 = arith.constant dense<0.000000e+00> : vector<8x128xf32>
      %117 = vector.multi_reduction <add>, %116, %cst_72 [0] : vector<4x8x128xf32> to vector<8x128xf32>
      %118 = arith.addf %115, %117 : vector<8x128xf32>
      %c0_73 = arith.constant 0 : index
      %c0_74 = arith.constant 0 : index
      %c0_75 = arith.constant 0 : index
      %c0_76 = arith.constant 0 : index
      %119 = vector.load %arg6[%c0_73, %c0_74, %c0_75, %c0_76] : memref<1x1x32x128xf32, #tpu.memory_space<vmem>>, vector<1x1x8x128xf32>
      %120 = vector.shape_cast %119 : vector<1x1x8x128xf32> to vector<8x128xf32>
      %121 = vector.shape_cast %118 : vector<8x128xf32> to vector<1x1x8x128xf32>
      tpu.vector_store %arg6[%c0_73, %c0_74, %c0_75, %c0_76], %121 {strides = array<i32>} : memref<1x1x32x128xf32, #tpu.memory_space<vmem>>, vector<1x1x8x128xf32>,
      %c0_77 = arith.constant 0 : index
      %c0_78 = arith.constant 0 : index
      %c16 = arith.constant 16 : index
      %c0_79 = arith.constant 0 : index
      %122 = vector.load %arg6[%c0_77, %c0_78, %c16, %c0_79] : memref<1x1x32x128xf32, #tpu.memory_space<vmem>>, vector<1x1x8x128xf32>
      %123 = vector.shape_cast %122 : vector<1x1x8x128xf32> to vector<8x128xf32>
      %124 = vector.shape_cast %81 : vector<32x128xf32> to vector<4x8x128xf32>
      %cst_80 = arith.constant dense<0.000000e+00> : vector<8x128xf32>
      %125 = vector.multi_reduction <add>, %124, %cst_80 [0] : vector<4x8x128xf32> to vector<8x128xf32>
      %126 = arith.addf %123, %125 : vector<8x128xf32>
      %c0_81 = arith.constant 0 : index
      %c0_82 = arith.constant 0 : index
      %c16_83 = arith.constant 16 : index
      %c0_84 = arith.constant 0 : index
      %127 = vector.load %arg6[%c0_81, %c0_82, %c16_83, %c0_84] : memref<1x1x32x128xf32, #tpu.memory_space<vmem>>, vector<1x1x8x128xf32>
      %128 = vector.shape_cast %127 : vector<1x1x8x128xf32> to vector<8x128xf32>
      %129 = vector.shape_cast %126 : vector<8x128xf32> to vector<1x1x8x128xf32>
      tpu.vector_store %arg6[%c0_81, %c0_82, %c16_83, %c0_84], %129 {strides = array<i32>} : memref<1x1x32x128xf32, #tpu.memory_space<vmem>>, vector<1x1x8x128xf32>,
    } else {
    }
    %112 = arith.extui %108 : i1 to i32
    %c0_i32_67 = arith.constant 0 : i32
    %113 = arith.cmpi ne, %112, %c0_i32_67 : i32
    scf.if %113 {
      %114 = tpu.iota {dimensions = array<i32: 0>} : vector<32x128xi32>
      %115 = tpu.iota {dimensions = array<i32: 1>} : vector<32x128xi32>
      %c128_i32 = arith.constant 128 : i32
      %116 = vector.broadcast %c128_i32 : i32 to vector<32x128xi32>
      %117 = arith.muli %114, %116 : vector<32x128xi32>
      %118 = arith.addi %117, %115 : vector<32x128xi32>
      %c256_i32 = arith.constant 256 : i32
      %119 = vector.broadcast %c256_i32 : i32 to vector<32x128xi32>
      %120 = arith.cmpi slt, %118, %119 : vector<32x128xi32>
      %121 = arith.extui %120 : vector<32x128xi1> to vector<32x128xi32>
      %122 = arith.sitofp %121 : vector<32x128xi32> to vector<32x128xf32>
      %123 = arith.mulf %88, %122 : vector<32x128xf32>
      %124 = arith.mulf %81, %122 : vector<32x128xf32>
      %c0_68 = arith.constant 0 : index
      %c0_69 = arith.constant 0 : index
      %c0_70 = arith.constant 0 : index
      %c0_71 = arith.constant 0 : index
      %125 = vector.load %arg6[%c0_68, %c0_69, %c0_70, %c0_71] : memref<1x1x32x128xf32, #tpu.memory_space<vmem>>, vector<1x1x8x128xf32>
      %126 = vector.shape_cast %125 : vector<1x1x8x128xf32> to vector<8x128xf32>
      %127 = vector.shape_cast %123 : vector<32x128xf32> to vector<4x8x128xf32>
      %cst_72 = arith.constant dense<0.000000e+00> : vector<8x128xf32>
      %128 = vector.multi_reduction <add>, %127, %cst_72 [0] : vector<4x8x128xf32> to vector<8x128xf32>
      %129 = arith.addf %126, %128 : vector<8x128xf32>
      %c0_73 = arith.constant 0 : index
      %c0_74 = arith.constant 0 : index
      %c0_75 = arith.constant 0 : index
      %c0_76 = arith.constant 0 : index
      %130 = vector.load %arg6[%c0_73, %c0_74, %c0_75, %c0_76] : memref<1x1x32x128xf32, #tpu.memory_space<vmem>>, vector<1x1x8x128xf32>
      %131 = vector.shape_cast %130 : vector<1x1x8x128xf32> to vector<8x128xf32>
      %132 = vector.shape_cast %129 : vector<8x128xf32> to vector<1x1x8x128xf32>
      tpu.vector_store %arg6[%c0_73, %c0_74, %c0_75, %c0_76], %132 {strides = array<i32>} : memref<1x1x32x128xf32, #tpu.memory_space<vmem>>, vector<1x1x8x128xf32>,
      %c0_77 = arith.constant 0 : index
      %c0_78 = arith.constant 0 : index
      %c16 = arith.constant 16 : index
      %c0_79 = arith.constant 0 : index
      %133 = vector.load %arg6[%c0_77, %c0_78, %c16, %c0_79] : memref<1x1x32x128xf32, #tpu.memory_space<vmem>>, vector<1x1x8x128xf32>
      %134 = vector.shape_cast %133 : vector<1x1x8x128xf32> to vector<8x128xf32>
      %135 = vector.shape_cast %124 : vector<32x128xf32> to vector<4x8x128xf32>
      %cst_80 = arith.constant dense<0.000000e+00> : vector<8x128xf32>
      %136 = vector.multi_reduction <add>, %135, %cst_80 [0] : vector<4x8x128xf32> to vector<8x128xf32>
      %137 = arith.addf %134, %136 : vector<8x128xf32>
      %c0_81 = arith.constant 0 : index
      %c0_82 = arith.constant 0 : index
      %c16_83 = arith.constant 16 : index
      %c0_84 = arith.constant 0 : index
      %138 = vector.load %arg6[%c0_81, %c0_82, %c16_83, %c0_84] : memref<1x1x32x128xf32, #tpu.memory_space<vmem>>, vector<1x1x8x128xf32>
      %139 = vector.shape_cast %138 : vector<1x1x8x128xf32> to vector<8x128xf32>
      %140 = vector.shape_cast %137 : vector<8x128xf32> to vector<1x1x8x128xf32>
      tpu.vector_store %arg6[%c0_81, %c0_82, %c16_83, %c0_84], %140 {strides = array<i32>} : memref<1x1x32x128xf32, #tpu.memory_space<vmem>>, vector<1x1x8x128xf32>,
    } else {
    }
    return
  }
  func.func @transform_0(%arg0: i32, %arg1: i32, %arg2: i32, %arg3: memref<2xi32, #tpu.memory_space<smem>>) -> (i32, i32, i32, i32) {
    %c1_i32 = arith.constant 1 : i32
    %0 = arith.muli %arg1, %c1_i32 : i32
    %1 = arith.addi %0, %arg2 : i32
    %c0_i32 = arith.constant 0 : i32
    %c0_i32_0 = arith.constant 0 : i32
    %c0_i32_1 = arith.constant 0 : i32
    return %arg0, %c0_i32, %1, %c0_i32_0 : i32, i32, i32, i32
  }
  func.func @transform_1(%arg0: i32, %arg1: i32, %arg2: i32, %arg3: memref<2xi32, #tpu.memory_space<smem>>) -> (i32, i32, i32) {
    %c1_i32 = arith.constant 1 : i32
    %0 = arith.muli %arg1, %c1_i32 : i32
    %1 = arith.addi %0, %arg2 : i32
    %c0_i32 = arith.constant 0 : i32
    %c0_i32_0 = arith.constant 0 : i32
    return %arg0, %1, %c0_i32 : i32, i32, i32
  }
  func.func @transform_2(%arg0: i32, %arg1: i32, %arg2: i32, %arg3: memref<2xi32, #tpu.memory_space<smem>>) -> (i32, i32, i32, i32) {
    %c0_i32 = arith.constant 0 : i32
    %c0_i32_0 = arith.constant 0 : i32
    %c0_i32_1 = arith.constant 0 : i32
    return %arg0, %arg1, %c0_i32, %c0_i32_0 : i32, i32, i32, i32
  }
}

</mosaic_0001>

<bundles_post_ra>
// kernel: tpu_custom_call.1
= control target key start
LH: loop header
LB: loop body
LE: loop exit
PB: predicated region body
PF: predicated region fallthrough
CT: control target
= control target key end

     0   :  { %s1056_s12 = smov [#allocation3]   ;;  %s1546_s0 = inlined_call_operand.hbm [shape: s32[2], index: 0, kind: input, shape index: {}]   ;;  %s1547_s1 = inlined_call_operand.hbm [shape: f32[2,4,32,128], index: 1, kind: input, shape index: {}]   ;;  %s1548_s2 = inlined_call_operand.hbm [shape: s8[2,32,128], index: 2, kind: input, shape index: {}]   ;;  %s1549_s3 = inlined_call_operand.hbm [shape: f32[2,1,32,128], index: 3, kind: output, shape index: {}]  }
   0x1   :  { %9 = dma.hbm_to_smem %s1546_s0, 16, %s1056_s12, [#allocation2] }
   0x2   :  { %1018 = dma.done.wait [#allocation2], 16 }
   0x3   :  { %1019 = vsyncadd [#allocation2], 4294967280 }
   0x4   :  { %11 = sfence }
   0x5   :  { %12 = vsyncpa [#allocation5], 0 }
   0x6   :  { %14 = vsyncpa [#allocation5 + $0x1], 0 }
   0x7   :  { %15 = vsyncpa [#allocation8], 0 }
   0x8   :  { %17 = vsyncpa [#allocation8 + $0x1], 0 }
   0x9   :  { %18 = vsyncpa [#allocation6], 0 }
   0xa   :  { %20 = vsyncpa [#allocation6 + $0x1], 0  ;;  %s1089_s15 = smov 0   ;;  %s1091_s16 = smov 0  }
   0xb   :  { %s1093_s17 = smov 0   ;;  %s1095_s18 = smov 0  }
   0xc   :  { %s1097_s19 = smov 0   ;;  %s1099_s0 = smov 0  }
   0xd LB: > { %s733_s20 = sadd.s32 4294967295, %s1054_s0   ;;  %s734_s21 = sadd.s32 4294967294, %s1054_s0   ;;  %s1054_s0 = sphi %s1099_s0, %s26_s0   ;;  %s1050_s19 = sphi %s1097_s19, %s1580_s19   ;;  %s1046_s18 = sphi %s1095_s18, %s1579_s18   ;;  %s1042_s17 = sphi %s1093_s17, %s1578_s17   ;;  %s1038_s16 = sphi %s1091_s16, %s1577_s16   ;;  %s1034_s15 = sphi %s1089_s15, %s1576_s15  }
   0xe   : > { %s45_s22 = sadd.s32 1, %s1050_s19  ;;  %s56_s23 = sadd.s32 1, %s1042_s17 }
   0xf   : > { %p47_p0 = scmp.ge.s32.totalorder %s45_s22, 2  ;;  %p63_p1 = scmp.ne.s32.totalorder %s1042_s17, %s1038_s16 }
  0x10   : > { %p64_p2 = scmp.eq.s32.totalorder %s1054_s0, 0  ;;  %p69_p3 = scmp.ne.s32.totalorder %s1038_s16, %s1034_s15 }
  0x11   : > { %s1582_s22 = smov (%p47_p0, %s45_s22), 0  ;;  %p70_p5 = scmp.eq.s32.totalorder %s733_s20, 0 }
  0x12   : > { %p1130_p4 = por %p64_p2, %p63_p1  ;;  %s51_s25 = ssub.s32 %s1050_s19, %s1582_s22 }
  0x13   : > { %p125_p6 = scmp.eq.s32.totalorder %s733_s20, 1  ;;  %p54_p7 = scmp.eq.s32.totalorder %s51_s25, 0 }
  0x14   : > { %p1136_p8 = por %p70_p5, %p69_p3  ;;  %p131_p10 = scmp.eq.s32.totalorder %s734_s21, 1 }
  0x15   : > { %p1140_p9 = por %p125_p6, %p63_p1  ;;  %p736_p12 = scmp.ge.s32.totalorder %s1054_s0, 2 }
  0x16   : > { %s1145_s28 = scalar_select %p54_p7, %s1042_s17, %s56_s23  }
  0x17   : > { %p1147_p11 = por %p131_p10, %p69_p3  ;;  %p791_p13 = scmp.lt.s32.totalorder %s1054_s0, 2 }
  0x18   : > { %s1154_s30 = sand.u32 1, %s1042_s17   ;;  %s772_s5 = sshll.u32 %s1050_s19, 11 }
  0x19   : > { %s737_s4 = sshll.u32 %s1154_s30, 7  ;;  %s164_s8 = scalar_lea.hbm %s1547_s1, %s772_s5 }
  0x1a   : > { %s155_s9 = scalar_lea.vmem [#allocation4], %s737_s4  ;;  %p1163_p0 = pnand %p791_p13, %p1130_p4 }
  0x1b   : > { %s165_s10 = sshll.u32 %s155_s9, 4  ;;  %p742_p1 = scmp.ge.s32.totalorder %s1054_s0, 1  ;;  %s166_s10 = int_to_ptr.vmem [resolvable:$true] %s165_s10 }
  0x1c   : > { %s152_s12 = scalar_lea.sflag [#allocation5], %s1154_s30  ;;  %p914_p2 = pneg %p1163_p0 }
  0x1d   : > { %s925_s13 = scalar_lea.vmem %s166_s10, 2048  ;;  %s1057_s14 = smov [#allocation4]  }
  0x1e   : > { %p926_p3 = scmp.ne.s32.totalorder %s166_s10, %s925_s13  ;;  %s930_s20 = sshll.u32 %s1057_s14, 4  ;;  %s931_s20 = int_to_ptr.vmem [resolvable:$false] %s930_s20 }
  0x1f   : > { %s932_s21 = scalar_lea.vmem %s931_s20, 4096  ;;  %p933_p4 = scmp.lt.s32.totalorder %s166_s10, %s931_s20 }
  0x20   : > { %p928_p5 = pnand %p926_p3, %p914_p2  ;;  %p934_p7 = scmp.lt.s32.totalorder %s932_s21, %s925_s13 }
  0x22   : > { %p929_p6 = pneg %p928_p5  ;;  %p935_p10 = por %p934_p7, %p933_p4 }
  0x24   : > { %p936_p13 = pnand %p935_p10, %p929_p6 }
  0x26   : > { %939 = shalt.err (!%p936_p13)
}
  0x27   : > { %s1058_s23 = smov 128   ;;  %s1059_s24 = smov 8  }
  0x28   : > { %783 = dma.hbm_to_vmem [thread:$0]  (!%p1163_p0), %s164_s8, 2048, %s166_s10, %s152_s12, %s1058_s23, %s1058_s23, %s1059_s24  }
  0x29   : > { %p193_p3 = scmp.lt.s32.totalorder %s1054_s0, 3  ;;  %s740_s25 = sshll.u32 %s1154_s30, 3 }
  0x2a   : > { %s741_s4 = sshll.u32 %s1050_s19, 7  ;;  %s179_s13 = scalar_lea.vmem [#allocation7], %s740_s25 }
  0x2b   : > { %p1181_p5 = pnand %p742_p1, %p193_p3  ;;  %s186_s9 = scalar_lea.hbm %s1548_s2, %s741_s4 }
  0x2c   : > { %s188_s14 = sshll.u32 %s179_s13, 4  ;;  %s176_s20 = scalar_lea.sflag [#allocation8], %s1154_s30  ;;  %s189_s14 = int_to_ptr.vmem [resolvable:$true] %s188_s14 }
  0x2d   : > { %s953_s21 = scalar_lea.vmem %s189_s14, 128  ;;  %s1060_s8 = smov [#allocation7]  }
  0x2e   : > { %p954_p6 = scmp.ne.s32.totalorder %s189_s14, %s953_s21  ;;  %s958_s10 = sshll.u32 %s1060_s8, 4  ;;  %s959_s10 = int_to_ptr.vmem [resolvable:$false] %s958_s10 }
  0x2f   : > { %s960_s12 = scalar_lea.vmem %s959_s10, 256  ;;  %p961_p1 = scmp.lt.s32.totalorder %s189_s14, %s959_s10 }
  0x30   : > { %p956_p4 = pnand %p954_p6, %p914_p2  ;;  %p962_p10 = scmp.lt.s32.totalorder %s960_s12, %s953_s21 }
  0x32   : > { %p957_p7 = pneg %p956_p4  ;;  %p963_p13 = por %p962_p10, %p961_p1 }
  0x34   : > { %p964_p3 = pnand %p963_p13, %p957_p7 }
  0x36   : > { %967 = shalt.err (!%p964_p3)
}
  0x37   : > { %786 = dma.hbm_to_vmem [thread:$0]  (!%p1163_p0), %s186_s9, 128, %s189_s14, %s176_s20  }
  0x38   : > { %197 = sbr.rel (%p1181_p5) target bundleno = 162 (0xa2), region = 28  ;;  %s1197_s30 = sand.u32 (!%p1181_p5), 1, %s1038_s16  }
  0x39   : > { %s743_s23 = sshll.u32 (!%p1181_p5), %s1197_s30, 7  ;;  %s200_s24 = scalar_lea.sflag (!%p1181_p5), [#allocation5], %s1197_s30 }
  0x3a   : > { %s1201_s25 = scalar_lea.vmem (!%p1181_p5), [#allocation4], %s743_s23 }
  0x3d   : > { %1021 = dma.done.wait (%p1136_p8), %s200_s24, 2048  }
  0x3e   : > { %1023 = vsyncadd (%p1136_p8), %s200_s24, 4294965248  ;;  %s744_s11 = sshll.u32 %s1197_s30, 3  ;;  %s209_s4 = scalar_lea.sflag [#allocation8], %s1197_s30 }
  0x3f   : > { %s1209_s5 = scalar_lea.vmem [#allocation7], %s744_s11 }
  0x40   : > { %1025 = dma.done.wait (%p1136_p8), %s209_s4, 128  }
  0x41   : > { %1027 = vsyncadd (%p1136_p8), %s209_s4, 4294967168  ;;  %s1216_s6 = sld [smem:[#allocation3 + %s1046_s18]]  ;;  %v252_v0 = vld [vmem:[%s1201_s25] sm:$0xff]  ;;  %v253_v1 = vld [vmem:[%s1201_s25 + $0x8] sm:$0xff]  ;;  %v537_v50 = vlaneseq  ;;  %v1061_v62 = vmov 0   ;;  %s745_s14 = sshll.u32 %s1197_s30, 5 }
  0x42   : > { %v254_v2 = vld [vmem:[%s1201_s25 + $0x10] sm:$0xff]  ;;  %v255_v3 = vld [vmem:[%s1201_s25 + $0x18] sm:$0xff]  ;;  %v746_v4 = vld [vmem:[%s1201_s25 + $0x20] sm:$0xff]  ;;  %s1460_s21 = scalar_lea.vmem [#allocation9], %s745_s14  ;;  %s773_s10 = sshll.u32 %s1046_s18, 9 }
  0x43   : > { %v747_v5 = vld [vmem:[%s1201_s25 + $0x28] sm:$0xff]  ;;  %v748_v6 = vld [vmem:[%s1201_s25 + $0x30] sm:$0xff]  ;;  %v749_v7 = vld [vmem:[%s1201_s25 + $0x38] sm:$0xff]  ;;  %v261_v8 = vmax.f32 %v252_v0, %v746_v4  ;;  %s615_s12 = sshll.u32 %s1460_s21, 4  ;;  %s600_s11 = scalar_lea.sflag [#allocation6], %s1197_s30  ;;  %s1496_s12 = int_to_ptr.vmem [resolvable:$true] %s615_s12 }
  0x44   : > { %v262_v9 = vmax.f32 %v253_v1, %v747_v5  ;;  %v750_v10 = vld [vmem:[%s1201_s25 + $0x40] sm:$0xff]  ;;  %v263_v11 = vmax.f32 %v254_v2, %v748_v6  ;;  %v264_v12 = vmax.f32 %v255_v3, %v749_v7  ;;  %v751_v13 = vld [vmem:[%s1201_s25 + $0x48] sm:$0xff]  ;;  %v752_v14 = vld [vmem:[%s1201_s25 + $0x50] sm:$0xff]  ;;  %s968_s4 = scalar_lea.vmem %s1496_s12, 512  ;;  %s1063_s18 = smov [#allocation9]  }
  0x45   : > { %v753_v15 = vld [vmem:[%s1201_s25 + $0x58] sm:$0xff]  ;;  %v270_v16 = vmax.f32 %v261_v8, %v750_v10  ;;  %v1231_v18 = vld [vmem:[%s1201_s25 + $0x60] sm:$0xff]  ;;  %v1234_v19 = vld [vmem:[%s1201_s25 + $0x68] sm:$0xff]  ;;  %p969_p6 = scmp.ne.s32.totalorder %s1496_s12, %s968_s4 }
  0x46   : > { %v271_v17 = vmax.f32 %v262_v9, %v751_v13  ;;  %v1237_v20 = vld [vmem:[%s1201_s25 + $0x70] sm:$0xff]  ;;  %v272_v21 = vmax.f32 %v263_v11, %v752_v14  ;;  %v273_v22 = vmax.f32 %v264_v12, %v753_v15  ;;  %v1241_v23 = vld [vmem:[%s1201_s25 + $0x78] sm:$0xff]  ;;  %v473_v49 = vld [vmem:[%s1209_s5] sm:$0xff]  ;;  %s972_s5 = sshll.u32 %s1063_s18, 4  ;;  %s973_s5 = int_to_ptr.vmem [resolvable:$false] %s972_s5 }
  0x47   : > { %p295_p8 = scmp.eq.s32.totalorder %s1216_s6, 0  ;;  %v1244_v24 = vmax.f32 %v270_v16, %v1231_v18  ;;  %p327_p0 = scmp.eq.s32.totalorder %s1216_s6, 1  ;;  %vm474_vm1 = vnez %v473_v49 }
  0x48   : > { %v1247_v25 = vmax.f32 %v271_v17, %v1234_v19  ;;  %v1251_v26 = vmax.f32 %v272_v21, %v1237_v20  ;;  %v1254_v27 = vmax.f32 %v273_v22, %v1241_v23  ;;  %p359_p2 = scmp.eq.s32.totalorder %s1216_s6, 2  ;;  %p391_p5 = scmp.eq.s32.totalorder %s1216_s6, 3  ;;  %v475_v63 = vsel %vm474_vm1, 16843009, %v1061_v62 }
  0x49   : > { %v283_v28 = vsub.f32 %v252_v0, %v1244_v24  ;;  %s296_s26 = scalar_select %p295_p8, 1, 0  ;;  %v315_v30 = vsub.f32 %v746_v4, %v1244_v24  ;;  %v347_v40 = vsub.f32 %v750_v10, %v1244_v24  ;;  %v379_v56 = vsub.f32 %v1231_v18, %v1244_v24 }
  0x4a   : > { %v284_v29 = vsub.f32 %v253_v1, %v1247_v25  ;;  %v285_v31 = vsub.f32 %v254_v2, %v1251_v26  ;;  %v286_v32 = vsub.f32 %v255_v3, %v1254_v27  ;;  %v316_v33 = vsub.f32 %v747_v5, %v1247_v25  ;;  %s1266_s7 = scalar_select %p327_p0, 1, 0 }
  0x4b   : > { %v287_v34 = vmul.f32 1.442695, %v283_v28  ;;  %v317_v36 = vsub.f32 %v748_v6, %v1251_v26  ;;  %v318_v39 = vsub.f32 %v749_v7, %v1254_v27  ;;  %s1272_s9 = scalar_select %p359_p2, 1, 0  ;;  %v297_v41 = vstv %s296_s26 }
  0x4c   : > { %v289_v35 = vmul.f32 1.442695, %v284_v29  ;;  %v291_v37 = vmul.f32 1.442695, %v285_v31  ;;  %v293_v38 = vmul.f32 1.442695, %v286_v32  ;;  %v348_v43 = vsub.f32 %v751_v13, %v1247_v25  ;;  %p970_p4 = pnand %p969_p6, %p1140_p9  ;;  %p975_p1 = scmp.lt.s32.totalorder %s1496_s12, %s973_s5 }
  0x4d   : > { %848 = vpow2.f32 %v287_v34  ;;  %v319_v42 = vmul.f32 1.442695, %v315_v30  ;;  %v321_v44 = vmul.f32 1.442695, %v316_v33  ;;  %v349_v45 = vsub.f32 %v752_v14, %v1251_v26  ;;  %s1299_s13 = scalar_select %p391_p5, 1, 0 }
  0x4e   : > { %850 = vpow2.f32 %v289_v35  ;;  %v350_v46 = vsub.f32 %v753_v15, %v1254_v27  ;;  %v323_v47 = vmul.f32 1.442695, %v317_v36  ;;  %v329_v48 = vstv %s1266_s7  ;;  %s758_s20 = sshll.u32 %s1216_s6, 5  ;;  %p971_p7 = pneg %p970_p4 }
  0x4f   : > { %852 = vpow2.f32 %v291_v37  ;;  %vm1279_vm0 = vcmp.eq.s32.totalorder %v297_v41, 1  ;;  %v325_v52 = vmul.f32 1.442695, %v318_v39  ;;  %v351_v53 = vmul.f32 1.442695, %v347_v40  ;;  %s416_s8 = scalar_lea.vmem %s1201_s25, %s758_s20 [#allocation4]  ;;  %s1494_s25 = scalar_lea.hbm %s1549_s3, %s773_s10 }
  0x50   : > { %854 = vpow2.f32 %v293_v38  ;;  %v361_v54 = vstv %s1272_s9  ;;  %v353_v55 = vmul.f32 1.442695, %v348_v43  ;;  %v380_v57 = vsub.f32 %v1234_v19, %v1247_v25  ;;  %s974_s6 = scalar_lea.vmem %s973_s5, 1024 }
  0x51   : > { %856 = vpow2.f32 %v319_v42  ;;  %v355_v58 = vmul.f32 1.442695, %v349_v45  ;;  %v357_v59 = vmul.f32 1.442695, %v350_v46  ;;  %v381_v60 = vsub.f32 %v1237_v20, %v1251_v26  ;;  %p976_p10 = scmp.lt.s32.totalorder %s974_s6, %s968_s4 }
  0x52   : > { %858 = vpow2.f32 %v321_v44  ;;  %v382_v61 = vsub.f32 %v1241_v23, %v1254_v27  ;;  %vm1293_vm2 = vcmp.eq.s32.totalorder %v329_v48, 1  ;;  %v476_v1 = vunpack.c.0.s8 %v475_v63 }
  0x53   : > { %860 = vpow2.f32 %v323_v47  ;;  %v477_v2 = vunpack.c.1.s8 %v475_v63  ;;  %v478_v3 = vunpack.c.2.s8 %v475_v63  ;;  %v383_v4 = vmul.f32 1.442695, %v379_v56  ;;  %p977_p13 = por %p976_p10, %p975_p1 }
  0x54   : > { %862 = vpow2.f32 %v325_v52  ;;  %v385_v5 = vmul.f32 1.442695, %v380_v57  ;;  %v479_v6 = vunpack.c.3.s8 %v475_v63  ;;  %v480_v7 = vpack.c.b16 %v476_v1, %v476_v1 }
  0x55   : > { %864 = vpow2.f32 %v351_v53  ;;  %v482_v8 = vpack.c.b16 %v477_v2, %v477_v2  ;;  %v484_v9 = vpack.c.b16 %v478_v3, %v478_v3  ;;  %v387_v10 = vmul.f32 1.442695, %v381_v60  ;;  %p978_p3 = pnand %p977_p13, %p971_p7 }
  0x56   : > { %866 = vpow2.f32 %v353_v55  ;;  %v389_v11 = vmul.f32 1.442695, %v382_v61  ;;  %v486_v12 = vpack.c.b16 %v479_v6, %v479_v6  ;;  %v481_v13 = vpack.c.b8 %v480_v7, %v480_v7 }
  0x57   : > { %868 = vpow2.f32 %v355_v58  ;;  %v483_v14 = vpack.c.b8 %v482_v8, %v482_v8  ;;  %v485_v15 = vpack.c.b8 %v484_v9, %v484_v9  ;;  %vm1301_vm3 = vcmp.eq.s32.totalorder %v361_v54, 1 }
  0x58   : > { %870 = vpow2.f32 %v357_v59  ;;  %v393_v17 = vstv %s1299_s13  ;;  %v487_v18 = vpack.c.b8 %v486_v12, %v486_v12  ;;  %vm488_vm4 = vnez %v481_v13 }
  0x59   : > { %872 = vpow2.f32 %v383_v4  ;;  %vm1306_vm5 = vnez %v483_v14  ;;  %vm1310_vm6 = vnez %v485_v15  ;;  %vm1322_vm8 = vcmp.eq.s32.totalorder %v393_v17, 1 }
  0x5a   : > { %v849_v19 = vpop.eup %848  ;;  %874 = vpow2.f32 %v385_v5  ;;  %vm491_vm7 = vnez %v487_v18  ;;  %v1326_v33 = vsel %vm488_vm4, 16843009, %v1061_v62  ;;  %v1334_v37 = vsel %vm1306_vm5, 16843009, %v1061_v62 }
  0x5b   : > { %v851_v22 = vpop.eup %850  ;;  %v299_v23 = vsel %vm1279_vm0, %v849_v19, 0.0  ;;  %v307_v28 = vsel %vm1279_vm0, 0.0, %v849_v19  ;;  %876 = vpow2.f32 %v387_v10  ;;  %v1338_v38 = vsel %vm1310_vm6, 16843009, %v1061_v62 }
  0x5c   : > { %v853_v29 = vpop.eup %852  ;;  %v300_v30 = vsel %vm1279_vm0, %v851_v22, 0.0  ;;  %v308_v31 = vsel %vm1279_vm0, 0.0, %v851_v22  ;;  %878 = vpow2.f32 %v389_v11  ;;  %v1344_v42 = vsel %vm491_vm7, 16843009, %v1061_v62 }
  0x5d   : > { %v855_v34 = vpop.eup %854  ;;  %v301_v35 = vsel %vm1279_vm0, %v853_v29, 0.0  ;;  %v309_v36 = vsel %vm1279_vm0, 0.0, %v853_v29  ;;  %v496_v43 = vunpack.c.0.s8 %v1326_v33  ;;  %v497_v47 = vunpack.c.0.s8 %v1334_v37 }
  0x5e   : > { %v857_v39 = vpop.eup %856  ;;  %v302_v40 = vsel %vm1279_vm0, %v855_v34, 0.0  ;;  %v310_v41 = vsel %vm1279_vm0, 0.0, %v855_v34  ;;  %v498_v48 = vunpack.c.0.s8 %v1338_v38 }
  0x5f   : > { %v859_v44 = vpop.eup %858  ;;  %v331_v45 = vsel %vm1293_vm2, %v857_v39, 0.0  ;;  %v339_v46 = vsel %vm1293_vm2, 0.0, %v857_v39  ;;  %vm1410_vm9 = vcmp.ne.s32.totalorder %v496_v43, 0  ;;  %vm1417_vm10 = vcmp.ne.s32.totalorder %v497_v47, 0 }
  0x60   : > { %v861_v49 = vpop.eup %860  ;;  %v332_v51 = vsel %vm1293_vm2, %v859_v44, 0.0  ;;  %v335_v52 = vadd.f32 %v331_v45, %v299_v23  ;;  %v340_v53 = vsel %vm1293_vm2, 0.0, %v859_v44  ;;  %v343_v54 = vadd.f32 %v339_v46, %v307_v28 }
  0x61   : > { %v863_v55 = vpop.eup %862  ;;  %v333_v56 = vsel %vm1293_vm2, %v861_v49, 0.0  ;;  %v336_v57 = vadd.f32 %v332_v51, %v300_v30  ;;  %v341_v58 = vsel %vm1293_vm2, 0.0, %v861_v49  ;;  %v344_v59 = vadd.f32 %v340_v53, %v308_v31 }
  0x62   : > { %v865_v60 = vpop.eup %864  ;;  %v334_v61 = vsel %vm1293_vm2, %v863_v55, 0.0  ;;  %v337_v62 = vadd.f32 %v333_v56, %v301_v35  ;;  %v342_v63 = vsel %vm1293_vm2, 0.0, %v863_v55  ;;  %v345_v1 = vadd.f32 %v341_v58, %v309_v36 }
  0x63   : > { %v867_v2 = vpop.eup %866  ;;  %v338_v3 = vadd.f32 %v334_v61, %v302_v40  ;;  %v346_v4 = vadd.f32 %v342_v63, %v310_v41  ;;  %v363_v5 = vsel %vm1301_vm3, %v865_v60, 0.0  ;;  %v371_v6 = vsel %vm1301_vm3, 0.0, %v865_v60 }
  0x64   : > { %v869_v7 = vpop.eup %868  ;;  %v364_v8 = vsel %vm1301_vm3, %v867_v2, 0.0  ;;  %v367_v9 = vadd.f32 %v363_v5, %v335_v52  ;;  %v372_v10 = vsel %vm1301_vm3, 0.0, %v867_v2  ;;  %v375_v0 = vadd.f32 %v371_v6, %v343_v54 }
  0x65   : > { %v871_v11 = vpop.eup %870  ;;  %v365_v12 = vsel %vm1301_vm3, %v869_v7, 0.0  ;;  %v368_v13 = vadd.f32 %v364_v8, %v336_v57  ;;  %v373_v14 = vsel %vm1301_vm3, 0.0, %v869_v7  ;;  %v376_v15 = vadd.f32 %v372_v10, %v344_v59 }
  0x66   : > { %v873_v17 = vpop.eup %872  ;;  %v366_v18 = vsel %vm1301_vm3, %v871_v11, 0.0  ;;  %v369_v19 = vadd.f32 %v365_v12, %v337_v62  ;;  %v374_v20 = vsel %vm1301_vm3, 0.0, %v871_v11  ;;  %v377_v21 = vadd.f32 %v373_v14, %v345_v1 }
  0x67   : > { %v875_v22 = vpop.eup %874  ;;  %v370_v23 = vadd.f32 %v366_v18, %v338_v3  ;;  %v378_v28 = vadd.f32 %v374_v20, %v346_v4  ;;  %v395_v29 = vsel %vm1322_vm8, %v873_v17, 0.0  ;;  %v403_v30 = vsel %vm1322_vm8, 0.0, %v873_v17  ;;  %v418_v17 = vld [vmem:[%s416_s8 + $0x8] sm:$0xff]  ;;  %v420_v20 = vld [vmem:[%s416_s8 + $0x18] sm:$0xff] }
  0x68   : > { %v877_v31 = vpop.eup %876  ;;  %v396_v34 = vsel %vm1322_vm8, %v875_v22, 0.0  ;;  %v1387_v35 = vadd.f32 %v395_v29, %v367_v9  ;;  %v404_v16 = vsel %vm1322_vm8, 0.0, %v875_v22  ;;  %v407_v36 = vadd.f32 %v403_v30, %v375_v0 }
  0x69   : > { %v879_v39 = vpop.eup %878  ;;  %v397_v40 = vsel %vm1322_vm8, %v877_v31, 0.0  ;;  %v1393_v41 = vadd.f32 %v396_v34, %v368_v13  ;;  %v405_v44 = vsel %vm1322_vm8, 0.0, %v877_v31  ;;  %v408_v45 = vadd.f32 %v404_v16, %v376_v15  ;;  %v417_v15 = vld [vmem:[%s416_s8] sm:$0xff] }
  0x6a   : > { %v398_v46 = vsel %vm1322_vm8, %v879_v39, 0.0  ;;  %v1399_v49 = vadd.f32 %v397_v40, %v369_v19  ;;  %v406_v51 = vsel %vm1322_vm8, 0.0, %v879_v39  ;;  %v409_v52 = vadd.f32 %v405_v44, %v377_v21  ;;  %v419_v19 = vld [vmem:[%s416_s8 + $0x10] sm:$0xff] }
  0x6b   : > { %v1403_v53 = vadd.f32 %v398_v46, %v370_v23  ;;  %v410_v54 = vadd.f32 %v406_v51, %v378_v28  ;;  %v538_v55 = vshrl.u32 %v537_v50, 7  ;;  %v411_v56 = vadd.f32 %v407_v36, %v1387_v35 }
  0x6c   : > { %880 = vlog2.f32 %v407_v36  ;;  %v499_v57 = vunpack.c.0.s8 %v1344_v42  ;;  %v412_v32 = vadd.f32 %v408_v45, %v1393_v41  ;;  %vm1423_vm11 = vcmp.ne.s32.totalorder %v498_v48, 0 }
  0x6d   : > { %882 = vlog2.f32 %v408_v45  ;;  %v413_v33 = vadd.f32 %v409_v52, %v1399_v49  ;;  %v1062_v43 = vmov 0.0   ;;  %v414_v38 = vadd.f32 %v410_v54, %v1403_v53 }
  0x6e   : > { %884 = vlog2.f32 %v409_v52  ;;  %v1431_v60 = vsel %vm1410_vm9, 1.0, %v1062_v43  ;;  %v1436_v37 = vsel %vm1417_vm10, 1.0, %v1062_v43  ;;  %vm1439_vm12 = vcmp.ne.s32.totalorder %v499_v57, 0 }
  0x6f   : > { %886 = vlog2.f32 %v410_v54  ;;  %v527_v48 = vadd.f32 %v1436_v37, %v1431_v60  ;;  %v1448_v61 = vsel %vm1423_vm11, 1.0, %v1062_v43  ;;  %v539_v62 = vadd.s32 8, %v538_v55 }
  0x70   : > { %888 = vrcp.f32 %v411_v56  ;;  %v540_v1 = vadd.s32 16, %v538_v55  ;;  %v541_v2 = vadd.s32 24, %v538_v55  ;;  %v1455_v3 = vsel %vm1439_vm12, 1.0, %v1062_v43 }
  0x71   : > { %890 = vrcp.f32 %v412_v32  ;;  %v528_v63 = vadd.f32 %v1448_v61, %v527_v48  ;;  %v543_v5 = vand.u32 127, %v537_v50  ;;  %v544_v6 = vmul.u32 128, %v538_v55 }
  0x72   : > { %892 = vrcp.f32 %v413_v33  ;;  %v545_v7 = vmul.u32 128, %v539_v62  ;;  %v546_v8 = vmul.u32 128, %v540_v1  ;;  %v421_v28 = vsub.f32 %v417_v15, %v1244_v24 }
  0x73   : > { %894 = vrcp.f32 %v414_v38  ;;  %v529_v4 = vadd.f32 %v1455_v3, %v528_v63  ;;  %v547_v9 = vmul.u32 128, %v541_v2  ;;  %v548_v10 = vadd.s32 %v544_v6, %v543_v5 }
  0x74   : > { %896 = vlog2.f32 %v411_v56  ;;  %v549_v0 = vadd.s32 %v545_v7, %v543_v5  ;;  %v550_v12 = vadd.s32 %v546_v8, %v543_v5  ;;  %v422_v29 = vsub.f32 %v418_v17, %v1247_v25 }
  0x75   : > { %898 = vlog2.f32 %v412_v32  ;;  %531 = vst [vmem:[%s1460_s21 + $0x18] sm:$0xff] %v529_v4  ;;  %v551_v13 = vadd.s32 %v547_v9, %v543_v5  ;;  %vm552_vm13 = vcmp.lt.s32.totalorder %v548_v10, 256  ;;  %v423_v16 = vsub.f32 %v419_v19, %v1251_v26 }
  0x76   : > { %900 = vlog2.f32 %v413_v33  ;;  %vm553_vm14 = vcmp.lt.s32.totalorder %v549_v0, 256  ;;  %vm554_vm15 = vcmp.lt.s32.totalorder %v550_v12, 256  ;;  %v763_v30 = vsel %vm552_vm13, 1.0, %v1062_v43 }
  0x77   : > { %902 = vlog2.f32 %v414_v38  ;;  %vm555_vm0 = vcmp.lt.s32.totalorder %v551_v13, 256  ;;  %v424_v36 = vsub.f32 %v420_v20, %v1254_v27  ;;  %v764_v39 = vsel %vm553_vm14, 1.0, %v1062_v43 }
  0x78   : > { %v765_v46 = vsel %vm554_vm15, 1.0, %v1062_v43  ;;  %v766_v51 = vsel %vm555_vm0, 1.0, %v1062_v43 }
  0x79   : > { %v881_v11 = vpop.eup %880 }
  0x7a   : > { %v883_v50 = vpop.eup %882  ;;  %v438_v54 = vmul.f32 0.6931472, %v881_v11 }
  0x7b   : > { %v885_v14 = vpop.eup %884  ;;  %v440_v55 = vmul.f32 0.6931472, %v883_v50 }
  0x7c   : > { %v887_v18 = vpop.eup %886  ;;  %v442_v48 = vmul.f32 0.6931472, %v885_v14 }
  0x7d   : > { %v889_v21 = vpop.eup %888 }
  0x7e   : > { %v891_v22 = vpop.eup %890  ;;  %v453_v23 = vmul.f32 %v889_v21, %v411_v56 }
  0x7f   : > { %v893_v31 = vpop.eup %892  ;;  %v454_v34 = vmul.f32 %v891_v22, %v412_v32 }
  0x80   : > { %v895_v40 = vpop.eup %894  ;;  %v455_v44 = vmul.f32 %v893_v31, %v413_v33  ;;  %v457_v45 = vsub.f32 2.0, %v453_v23  ;;  %v444_v33 = vmul.f32 0.6931472, %v887_v18 }
  0x81   : > { %v897_v24 = vpop.eup %896  ;;  %v456_v52 = vmul.f32 %v895_v40, %v414_v38  ;;  %v458_v25 = vsub.f32 2.0, %v454_v34 }
  0x82   : > { %v899_v56 = vpop.eup %898  ;;  %v459_v57 = vsub.f32 2.0, %v455_v44  ;;  %v461_v32 = vmul.f32 %v889_v21, %v457_v45  ;;  %v426_v26 = vmul.f32 0.6931472, %v897_v24 }
  0x83   : > { %v901_v27 = vpop.eup %900  ;;  %v460_v62 = vsub.f32 2.0, %v456_v52  ;;  %v462_v63 = vmul.f32 %v891_v22, %v458_v25  ;;  %v428_v1 = vmul.f32 0.6931472, %v899_v56 }
  0x84   : > { %v903_v2 = vpop.eup %902  ;;  %v463_v4 = vmul.f32 %v893_v31, %v459_v57  ;;  %v465_v5 = vmul.f32 %v461_v32, %v1387_v35  ;;  %v430_v43 = vmul.f32 0.6931472, %v901_v27  ;;  %v433_v6 = vsub.f32 %v421_v28, %v426_v26 }
  0x85   : > { %v464_v38 = vmul.f32 %v895_v40, %v460_v62  ;;  %v466_v7 = vmul.f32 %v462_v63, %v1393_v41  ;;  %v432_v8 = vmul.f32 0.6931472, %v903_v2  ;;  %v434_v9 = vsub.f32 %v422_v29, %v428_v1 }
  0x86   : > { %v467_v10 = vmul.f32 %v463_v4, %v1399_v49  ;;  %v469_v0 = vadd.f32 1e-10, %v465_v5  ;;  %v435_v11 = vsub.f32 %v423_v16, %v430_v43  ;;  %v445_v12 = vsub.f32 %v438_v54, %v426_v26 }
  0x87   : > { %v468_v13 = vmul.f32 %v464_v38, %v1403_v53  ;;  %v470_v50 = vadd.f32 1e-10, %v466_v7  ;;  %v436_v14 = vsub.f32 %v424_v36, %v432_v8  ;;  %v446_v15 = vsub.f32 %v440_v55, %v428_v1 }
  0x88   : > { %v471_v17 = vadd.f32 1e-10, %v467_v10  ;;  %v517_v35 = vmul.f32 %v1431_v60, %v469_v0  ;;  %v447_v18 = vsub.f32 %v442_v48, %v430_v43  ;;  %v448_v19 = vsub.f32 %v444_v33, %v432_v8 }
  0x89   : > { %v472_v20 = vadd.f32 1e-10, %v468_v13  ;;  %v518_v41 = vmul.f32 %v1436_v37, %v470_v50  ;;  %v512_v21 = vsel %vm1410_vm9, %v433_v6, %v445_v12  ;;  %v513_v49 = vsel %vm1417_vm10, %v434_v9, %v446_v15 }
  0x8a   : > { %v519_v22 = vmul.f32 %v1448_v61, %v471_v17  ;;  %v514_v53 = vsel %vm1423_vm11, %v435_v11, %v447_v18  ;;  %v515_v23 = vsel %vm1439_vm12, %v436_v14, %v448_v19  ;;  %v564_v60 = vmul.f32 %v763_v30, %v512_v21 }
  0x8b   : > { %v520_v28 = vmul.f32 %v1455_v3, %v472_v20  ;;  %v521_v37 = vadd.f32 %v518_v41, %v517_v35  ;;  %v565_v29 = vmul.f32 %v764_v39, %v513_v49  ;;  %v566_v58 = vmul.f32 %v765_v46, %v514_v53 }
  0x8c   : > { %v568_v31 = vmul.f32 %v763_v30, %v469_v0  ;;  %v569_v59 = vmul.f32 %v764_v39, %v470_v50  ;;  %v570_v34 = vmul.f32 %v765_v46, %v471_v17  ;;  %v567_v42 = vmul.f32 %v766_v51, %v515_v23 }
  0x8d   : > { %v522_v61 = vadd.f32 %v521_v37, %v519_v22  ;;  %v573_v16 = vadd.f32 %v565_v29, %v564_v60  ;;  %v571_v47 = vmul.f32 %v766_v51, %v472_v20 }
  0x8e   : > { %v579_v36 = vadd.f32 %v569_v59, %v568_v31 }
  0x8f   : > { %v523_v40 = vadd.f32 %v522_v61, %v520_v28  ;;  %v574_v44 = vadd.f32 %v573_v16, %v566_v58 }
  0x90   : > { %v580_v3 = vadd.f32 %v579_v36, %v570_v34 }
  0x91   : > { %v575_v45 = vadd.f32 %v574_v44, %v567_v42  ;;  %525 = vst [vmem:[%s1460_s21 + $0x8] sm:$0xff] %v523_v40 }
  0x92   : > { %v581_v24 = vadd.f32 %v580_v3, %v571_v47 }
  0x93   : > { %577 = vst [vmem:[%s1460_s21] sm:$0xff] %v575_v45 }
  0x94   : > { %583 = vst [vmem:[%s1460_s21 + $0x10] sm:$0xff] %v581_v24 }
  0x95   : > { %981 = shalt.err (!%p978_p3)
}
  0x96   : > { %s982_s26 = scalar_lea.hbm %s1494_s25, 512  ;;  %s986_s13 = scalar_lea.hbm %s1549_s3, 1024 }
  0x97   : > { %p983_p8 = scmp.ne.s32.totalorder %s1494_s25, %s982_s26  ;;  %p987_p5 = scmp.lt.s32.totalorder %s1494_s25, %s1549_s3 }
  0x98   : > { %p988_p6 = scmp.lt.s32.totalorder %s986_s13, %s982_s26 }
  0x99   : > { %p984_p0 = pnand %p983_p8, %p1140_p9 }
  0x9a   : > { %p989_p4 = por %p988_p6, %p987_p5 }
  0x9b   : > { %p985_p2 = pneg %p984_p0 }
  0x9d   : > { %p990_p7 = pnand %p989_p4, %p985_p2 }
  0x9f   : > { %993 = shalt.err (!%p990_p7)
}
  0xa0   : > { %s1064_s21 = smov 128   ;;  %s1065_s8 = smov 8  }
  0xa1   : > { %778 = dma.vmem_to_hbm [thread:$0]  (%p1140_p9), %s1496_s12, 512, %s1494_s25, %s600_s11, %s1064_s21, %s1064_s21, %s1065_s8  }
  0xa2 PF: > { %s630_s10 = sand.u32 1, %s1034_s15   ;;  %p788_p1 = pnand %p736_p12, %p1147_p11 }
  0xa3   : > { %s631_s23 = scalar_lea.sflag [#allocation6], %s630_s10 }
  0xa4   : > { %p789_p10 = pneg %p788_p1 }
  0xa6   : > { %1029 = dma.done.wait (%p789_p10), %s631_s23, 512  }
  0xa7   : > { %1031 = vsyncadd (%p789_p10), %s631_s23, 4294966784  ;;  %s26_s0 = sadd.s32 1, %s1054_s0   ;;  %s1576_s15 = smov %s1038_s16 }
  0xa8   : > { %p23_p13 = scmp.ge.s32.totalorder %s26_s0, 4   ;;  %s1577_s16 = smov %s1042_s17 }
  0xa9   : > { %s1578_s17 = smov %s1145_s28  ;;  %s1579_s18 = smov %s1050_s19 }
  0xaa   : > { %s1580_s19 = smov %s1582_s22  ;;  %25 = sbr.rel (!%p23_p13) target bundleno = 13 (0xd), region = 102 }
  0xaf   :  { %636 = vsyncpa [#allocation5], 1 }
  0xb0   :  { %638 = vsyncpa [#allocation5 + $0x1], 1 }
  0xb1   :  { %639 = vsyncpa [#allocation8], 1 }
  0xb2   :  { %641 = vsyncpa [#allocation8 + $0x1], 1 }
  0xb3   :  { %642 = vsyncpa [#allocation6], 1 }
  0xb4   :  { %644 = vsyncpa [#allocation6 + $0x1], 1 }

</bundles_post_ra>
